<compile_context>
chip_gen: v7x
topology: tpu7x:2x2x1
jax: 0.10.0
libtpu: 0.0.40
codegen_flags: <defaults>
</compile_context>

<pallas_src>
import functools

import jax
import jax.numpy as jnp
import numpy as np
from jax.experimental import pallas as pl
from jax.experimental.pallas import tpu as pltpu

LANES = 128
SUBLANES = 8
TILE_BYTES = 4 * 1024 * 1024       # 4 MiB per block per buffer (in and out)
VMEM_LIMIT_BYTES = 32 * 1024 * 1024  # safe on v5e/v6e (128 MiB) and v7x (64 MiB)


def _repact_kernel(params_ref, x_ref, o_ref):
    # params_ref (SMEM, float32, shape (3,)): [pos_coef, neg_coef, w_hsw6]
    pos_coef = params_ref[0]
    neg_coef = params_ref[1]
    w_hsw6 = params_ref[2]

    # Load native dtype, compute in f32 in-register (no extra HBM passes).
    x = x_ref[...].astype(jnp.float32)

    coef = jnp.where(x >= 0.0, pos_coef, neg_coef) + w_hsw6 * jnp.clip(x + 3.0, 0.0, 6.0)
    o_ref[...] = (x * coef).astype(o_ref.dtype)


@functools.partial(jax.jit, static_argnames=("core_parallel",))
def repact_softmax_pallas(x, actor_atn, prelu_a, core_parallel=True):
    """x: any shape / float dtype; actor_atn: (4,); prelu_a: scalar slope."""
    orig_shape = x.shape
    dtype = x.dtype
    itemsize = jnp.dtype(dtype).itemsize

    # --- scalar glue: softmax over the 4 logits + algebraic folding (free) ---
    w = jax.nn.softmax(actor_atn.astype(jnp.float32), axis=0)
    a = jnp.asarray(prelu_a, jnp.float32)
    pos_coef = w[0] + w[1] + w[2]          # x >= 0: identity + relu + prelu all pass x
    neg_coef = w[0] + a * w[2]             # x < 0 : relu -> 0, prelu -> a*x
    w_hsw6 = w[3] * (1.0 / 6.0)            # hardswish weight / 6
    params = jnp.stack([pos_coef, neg_coef, w_hsw6]).astype(jnp.float32)  # (3,)

    # --- flatten to a lane-dense (rows, 128) slab with MINIMAL padding ---
    flat = x.reshape(-1)                               # bitcast view, no copy
    n = flat.shape[0]
    chunk = SUBLANES * LANES                           # 1024
    n_pad_total = pl.cdiv(n, chunk) * chunk            # next multiple of 1024
    pad = n_pad_total - n
    if pad:
        # <=1023 zero elements; zeros are inert through the combine.
        flat = jnp.pad(flat, (0, pad))
    n_rows = n_pad_total // LANES                      # multiple of 8
    x2d = flat.reshape(n_rows, LANES)

    # --- block sizing: ~4 MiB per buffer, never rounding rows up to tile_r ---
    tile_r_max = max(SUBLANES, (TILE_BYTES // (LANES * itemsize)) // SUBLANES * SUBLANES)
    tile_r = min(tile_r_max, n_rows)                   # both multiples of 8
    grid = (pl.cdiv(n_rows, tile_r),)                  # partial last block is masked

    dim_sem = (pltpu.CORE_PARALLEL if core_parallel else pltpu.PARALLEL,)

    n_total = n_rows * LANES
    cost = pl.CostEstimate(
        flops=7 * n_total,
        transcendentals=0,
        bytes_accessed=2 * n_total * itemsize,
    )

    out2d = pl.pallas_call(
        _repact_kernel,
        out_shape=jax.ShapeDtypeStruct((n_rows, LANES), dtype),
        grid_spec=pltpu.PrefetchScalarGridSpec(
            num_scalar_prefetch=1,          # params -> SMEM, passed to index_maps
            grid=grid,
            in_specs=[pl.BlockSpec((tile_r, LANES), lambda i, params: (i, 0))],
            out_specs=pl.BlockSpec((tile_r, LANES), lambda i, params: (i, 0)),
        ),
        compiler_params=pltpu.CompilerParams(
            dimension_semantics=dim_sem,            # split row tiles across TCs (v7x)
            vmem_limit_bytes=VMEM_LIMIT_BYTES,      # 4 MiB blocks fit on v5e/v6e/v7x
        ),
        cost_estimate=cost,
    )(params, x2d)

    out = out2d.reshape(-1)
    if pad:
        out = out[:n]
    return out.reshape(orig_shape)


def _reference(x, actor_atn, prelu_a):
    w = jax.nn.softmax(actor_atn.astype(jnp.float32), axis=0)
    xf = x.astype(jnp.float32)
    relu = jnp.maximum(xf, 0.0)
    prelu = jnp.where(xf >= 0.0, xf, prelu_a * xf)
    hsw = xf * jnp.clip(xf + 3.0, 0.0, 6.0) / 6.0
    return w[1] * relu + w[0] * xf + w[3] * hsw + w[2] * prelu


def _run(x, actor_atn, prelu_a):
    # Prefer CORE_PARALLEL (splits the grid across v7x's two TensorCores);
    # fall back to plain PARALLEL if this chip/toolchain rejects it.
    try:
        return jax.block_until_ready(
            repact_softmax_pallas(x, actor_atn, prelu_a, core_parallel=True))
    except Exception:
        return jax.block_until_ready(
            repact_softmax_pallas(x, actor_atn, prelu_a, core_parallel=False))


if __name__ == "__main__":
    key = jax.random.PRNGKey(0)

    # Deterministic parameters (shapes match the PyTorch __init__).
    init_weight = jnp.array([1.0, 1.0, 1.0, 1.0], dtype=jnp.float32)  # ActorAtn, ActorNum=4
    prelu_a = jnp.float32(0.25)                                       # nn.PReLU() default init

    # Small NCHW activation.
    x = jax.random.normal(key, (2, 4, 16, 16), dtype=jnp.float32) * 3.0

    y = _run(x, init_weight, prelu_a)

    y_ref = _reference(x, init_weight, prelu_a)
    np.testing.assert_allclose(np.asarray(y), np.asarray(y_ref), rtol=1e-5, atol=1e-5)

    # Also exercise a ragged size (forces the minimal-pad / partial-block path).
    x_ragged = jax.random.normal(jax.random.PRNGKey(1), (3, 5, 7, 11), jnp.float32)
    y_ragged = _run(x_ragged, init_weight, prelu_a)
    np.testing.assert_allclose(np.asarray(y_ragged),
                               np.asarray(_reference(x_ragged, init_weight, prelu_a)),
                               rtol=1e-5, atol=1e-5)

    print("KERNEL_OK")
</pallas_src>

<mosaic_0001>
module attributes {stable_mosaic.version = 11 : i64} {
  func.func @_repact_kernel(%arg0: i32, %arg1: memref<3xf32, #tpu.memory_space<smem>>, %arg2: memref<16x128xf32, #tpu.memory_space<vmem>>, %arg3: memref<16x128xf32, #tpu.memory_space<vmem>>) attributes {dimension_semantics = [#tpu.dimension_semantics<core_parallel>], iteration_bounds = array<i64: 1>, scalar_prefetch = 1 : i64, scratch_operands = 0 : i64, tpu.core_type = #tpu.core_type<tc>, window_params = [{transform_indices = @transform_0, window_bounds = array<i64: 16, 128>}, {transform_indices = @transform_1, window_bounds = array<i64: 16, 128>}]} {
    %c0 = arith.constant 0 : index
    %0 = memref.load %arg1[%c0] : memref<3xf32, #tpu.memory_space<smem>>
    %c1 = arith.constant 1 : index
    %1 = memref.load %arg1[%c1] : memref<3xf32, #tpu.memory_space<smem>>
    %c2 = arith.constant 2 : index
    %2 = memref.load %arg1[%c2] : memref<3xf32, #tpu.memory_space<smem>>
    %c0_0 = arith.constant 0 : index
    %c0_1 = arith.constant 0 : index
    %3 = vector.load %arg2[%c0_0, %c0_1] : memref<16x128xf32, #tpu.memory_space<vmem>>, vector<16x128xf32>
    %cst = arith.constant 0.000000e+00 : f32
    %4 = vector.broadcast %cst : f32 to vector<16x128xf32>
    %5 = arith.cmpf oge, %3, %4 : vector<16x128xf32>
    %6 = vector.broadcast %0 : f32 to vector<16x128xf32>
    %7 = vector.broadcast %1 : f32 to vector<16x128xf32>
    %8 = arith.select %5, %6, %7 : vector<16x128xi1>, vector<16x128xf32>
    %cst_2 = arith.constant 3.000000e+00 : f32
    %9 = vector.broadcast %cst_2 : f32 to vector<16x128xf32>
    %10 = arith.addf %3, %9 : vector<16x128xf32>
    %cst_3 = arith.constant 0.000000e+00 : f32
    %cst_4 = arith.constant 6.000000e+00 : f32
    %11 = vector.broadcast %cst_3 : f32 to vector<16x128xf32>
    %12 = arith.maximumf %11, %10 : vector<16x128xf32>
    %13 = vector.broadcast %cst_4 : f32 to vector<16x128xf32>
    %14 = arith.minimumf %13, %12 : vector<16x128xf32>
    %15 = vector.broadcast %2 : f32 to vector<16x128xf32>
    %16 = arith.mulf %15, %14 : vector<16x128xf32>
    %17 = arith.addf %8, %16 : vector<16x128xf32>
    %18 = arith.mulf %3, %17 : vector<16x128xf32>
    %c0_5 = arith.constant 0 : index
    %c0_6 = arith.constant 0 : index
    %19 = vector.load %arg3[%c0_5, %c0_6] : memref<16x128xf32, #tpu.memory_space<vmem>>, vector<16x128xf32>
    tpu.vector_store %arg3[%c0_5, %c0_6], %18 {strides = array<i32>} : memref<16x128xf32, #tpu.memory_space<vmem>>, vector<16x128xf32>,
    return
  }
  func.func @transform_0(%arg0: i32, %arg1: memref<3xf32, #tpu.memory_space<smem>>) -> (i32, i32) {
    %c0_i32 = arith.constant 0 : i32
    %c0_i32_0 = arith.constant 0 : i32
    return %arg0, %c0_i32 : i32, i32
  }
  func.func @transform_1(%arg0: i32, %arg1: memref<3xf32, #tpu.memory_space<smem>>) -> (i32, i32) {
    %c0_i32 = arith.constant 0 : i32
    %c0_i32_0 = arith.constant 0 : i32
    return %arg0, %c0_i32 : i32, i32
  }
}

module attributes {stable_mosaic.version = 11 : i64} {
  func.func @_repact_kernel(%arg0: i32, %arg1: memref<3xf32, #tpu.memory_space<smem>>, %arg2: memref<16x128xf32, #tpu.memory_space<vmem>>, %arg3: memref<16x128xf32, #tpu.memory_space<vmem>>) attributes {dimension_semantics = [#tpu.dimension_semantics<parallel>], iteration_bounds = array<i64: 1>, scalar_prefetch = 1 : i64, scratch_operands = 0 : i64, tpu.core_type = #tpu.core_type<tc>, window_params = [{transform_indices = @transform_0, window_bounds = array<i64: 16, 128>}, {transform_indices = @transform_1, window_bounds = array<i64: 16, 128>}]} {
    %c0 = arith.constant 0 : index
    %0 = memref.load %arg1[%c0] : memref<3xf32, #tpu.memory_space<smem>>
    %c1 = arith.constant 1 : index
    %1 = memref.load %arg1[%c1] : memref<3xf32, #tpu.memory_space<smem>>
    %c2 = arith.constant 2 : index
    %2 = memref.load %arg1[%c2] : memref<3xf32, #tpu.memory_space<smem>>
    %c0_0 = arith.constant 0 : index
    %c0_1 = arith.constant 0 : index
    %3 = vector.load %arg2[%c0_0, %c0_1] : memref<16x128xf32, #tpu.memory_space<vmem>>, vector<16x128xf32>
    %cst = arith.constant 0.000000e+00 : f32
    %4 = vector.broadcast %cst : f32 to vector<16x128xf32>
    %5 = arith.cmpf oge, %3, %4 : vector<16x128xf32>
    %6 = vector.broadcast %0 : f32 to vector<16x128xf32>
    %7 = vector.broadcast %1 : f32 to vector<16x128xf32>
    %8 = arith.select %5, %6, %7 : vector<16x128xi1>, vector<16x128xf32>
    %cst_2 = arith.constant 3.000000e+00 : f32
    %9 = vector.broadcast %cst_2 : f32 to vector<16x128xf32>
    %10 = arith.addf %3, %9 : vector<16x128xf32>
    %cst_3 = arith.constant 0.000000e+00 : f32
    %cst_4 = arith.constant 6.000000e+00 : f32
    %11 = vector.broadcast %cst_3 : f32 to vector<16x128xf32>
    %12 = arith.maximumf %11, %10 : vector<16x128xf32>
    %13 = vector.broadcast %cst_4 : f32 to vector<16x128xf32>
    %14 = arith.minimumf %13, %12 : vector<16x128xf32>
    %15 = vector.broadcast %2 : f32 to vector<16x128xf32>
    %16 = arith.mulf %15, %14 : vector<16x128xf32>
    %17 = arith.addf %8, %16 : vector<16x128xf32>
    %18 = arith.mulf %3, %17 : vector<16x128xf32>
    %c0_5 = arith.constant 0 : index
    %c0_6 = arith.constant 0 : index
    %19 = vector.load %arg3[%c0_5, %c0_6] : memref<16x128xf32, #tpu.memory_space<vmem>>, vector<16x128xf32>
    tpu.vector_store %arg3[%c0_5, %c0_6], %18 {strides = array<i32>} : memref<16x128xf32, #tpu.memory_space<vmem>>, vector<16x128xf32>,
    return
  }
  func.func @transform_0(%arg0: i32, %arg1: memref<3xf32, #tpu.memory_space<smem>>) -> (i32, i32) {
    %c0_i32 = arith.constant 0 : i32
    %c0_i32_0 = arith.constant 0 : i32
    return %arg0, %c0_i32 : i32, i32
  }
  func.func @transform_1(%arg0: i32, %arg1: memref<3xf32, #tpu.memory_space<smem>>) -> (i32, i32) {
    %c0_i32 = arith.constant 0 : i32
    %c0_i32_0 = arith.constant 0 : i32
    return %arg0, %c0_i32 : i32, i32
  }
}

</mosaic_0001>

<bundles_post_ra>
// kernel: repact_softmax_pallas.1
= control target key start
LH: loop header
LB: loop body
LE: loop exit
PB: predicated region body
PF: predicated region fallthrough
CT: control target
= control target key end

     0   :  { %s3_s9 = sld [smem:[#allocation0]]   ;;  %s144_s0 = inlined_call_operand.vmem [shape: f32[3], index: 0, kind: input, shape index: {}]   ;;  %s145_s1 = inlined_call_operand.vmem [shape: f32[16,128], index: 1, kind: input, shape index: {}]   ;;  %s146_s2 = inlined_call_operand.vmem [shape: f32[16,128], index: 2, kind: output, shape index: {}]  }
   0x1   :  { %s7_s12 = sshll.u32 %s144_s0, 4  ;;  %s8_s12 = int_to_ptr.vmem [resolvable:$true] %s7_s12 }
   0x2   :  { %s105_s13 = scalar_lea.vmem %s8_s12, 16  ;;  %p110_p1 = scmp.lt.s32.totalorder %s8_s12, %s8_s12 }
   0x3   :  { %p106_p0 = scmp.ne.s32.totalorder %s8_s12, %s105_s13  ;;  %p111_p2 = scmp.lt.s32.totalorder %s105_s13, %s105_s13 }
   0x5   :  { %p112_p3 = por %p111_p2, %p110_p1 }
   0x7   :  { %p113_p4 = pnand %p112_p3, %p106_p0 }
   0x9   :  { %116 = shalt.err (!%p113_p4)  }
   0xa   :  { %s119_s14 = smov [#allocation3]  }
   0xb   :  { %10 = dma.vmem_to_smem %s8_s12, 16, %s119_s14, [#allocation2] }
   0xc   :  { %117 = dma.done.wait [#allocation2], 16 }
   0xd   :  { %118 = vsyncadd [#allocation2], 4294967280 }
   0xe   :  { %12 = sfence }
   0xf   :  { %s98_s15 = sshll.u32 %s3_s9, 1  ;;  %s43_s16 = sld [smem:[#allocation3]] }
  0x10   :  { %p32_p5 = scmp.lt.s32.totalorder %s98_s15, 1  ;;  %s102_s17 = sld [smem:[#allocation3 + $0x1]] }
  0x11   :  { %s103_s18 = sld [smem:[#allocation3 + $0x2]] }
  0x12   :  { %s148_s15 = smov (!%p32_p5, %s98_s15), 1 }
  0x13   :  { %s99_s0 = sshll.u32 %s148_s15, 3 }
  0x14   :  { %s35_s21 = scalar_lea.vmem %s145_s1, %s99_s0  ;;  %s41_s23 = scalar_lea.vmem %s146_s2, %s99_s0 }
  0x15   :  { %v46_v0 = vld [vmem:[%s35_s21] sm:$0xff]  ;;  %v47_v1 = vld [vmem:[%s35_s21 + $0x8] sm:$0xff]  ;;  %v50_v4 = vstv %s43_s16 }
  0x16   :  { %v54_v2 = vadd.f32 3.0, %v46_v0  ;;  %v55_v3 = vadd.f32 3.0, %v47_v1  ;;  %v51_v5 = vstv %s102_s17  ;;  %vm48_vm0 = vcmp.ge.f32.partialorder %v46_v0, 0.0 }
  0x17   :  { %vm49_vm1 = vcmp.ge.f32.partialorder %v47_v1, 0.0  ;;  %v60_v8 = vstv %s103_s18  ;;  %v52_v11 = vsel %vm48_vm0, %v50_v4, %v51_v5 }
  0x18   :  { %v56_v6 = vmax.f32 %v54_v2, 0.0  ;;  %v57_v7 = vmax.f32 %v55_v3, 0.0  ;;  %v53_v12 = vsel %vm49_vm1, %v50_v4, %v51_v5 }
  0x1a   :  { %v58_v9 = vmin.f32 %v56_v6, 6.0  ;;  %v59_v10 = vmin.f32 %v57_v7, 6.0 }
  0x1c   :  { %v61_v13 = vmul.f32 %v60_v8, %v58_v9  ;;  %v62_v14 = vmul.f32 %v60_v8, %v59_v10 }
  0x1e   :  { %v63_v15 = vadd.f32 %v61_v13, %v52_v11  ;;  %v64_v16 = vadd.f32 %v62_v14, %v53_v12 }
  0x20   :  { %v65_v17 = vmul.f32 %v63_v15, %v46_v0  ;;  %v66_v18 = vmul.f32 %v64_v16, %v47_v1 }
  0x22   :  { %67 = vst [vmem:[%s41_s23] sm:$0xff] %v65_v17  ;;  %68 = vst [vmem:[%s41_s23 + $0x8] sm:$0xff] %v66_v18 }

// kernel: repact_softmax_pallas.1
= control target key start
LH: loop header
LB: loop body
LE: loop exit
PB: predicated region body
PF: predicated region fallthrough
CT: control target
= control target key end

     0   :  { %s93_s0 = inlined_call_operand.vmem [shape: f32[3], index: 0, kind: input, shape index: {}]   ;;  %s94_s1 = inlined_call_operand.vmem [shape: f32[16,128], index: 1, kind: input, shape index: {}]   ;;  %s95_s2 = inlined_call_operand.vmem [shape: f32[16,128], index: 2, kind: output, shape index: {}]  }
   0x1   :  { %s7_s11 = sshll.u32 %s93_s0, 4  ;;  %s8_s11 = int_to_ptr.vmem [resolvable:$true] %s7_s11 }
   0x2   :  { %s48_s12 = scalar_lea.vmem %s8_s11, 16  ;;  %p53_p1 = scmp.lt.s32.totalorder %s8_s11, %s8_s11 }
   0x3   :  { %p49_p0 = scmp.ne.s32.totalorder %s8_s11, %s48_s12  ;;  %p54_p2 = scmp.lt.s32.totalorder %s48_s12, %s48_s12 }
   0x5   :  { %p55_p3 = por %p54_p2, %p53_p1 }
   0x7   :  { %p56_p4 = pnand %p55_p3, %p49_p0 }
   0x9   :  { %59 = shalt.err (!%p56_p4)  }
   0xa   :  { %s62_s13 = smov [#allocation3]  }
   0xb   :  { %10 = dma.vmem_to_smem %s8_s11, 16, %s62_s13, [#allocation2] }
   0xc   :  { %60 = dma.done.wait [#allocation2], 16 }
   0xd   :  { %61 = vsyncadd [#allocation2], 4294967280 }
   0xe   :  { %12 = sfence }
   0xf   :  { %s15_s14 = sld [smem:[#allocation3]]  ;;  %s45_s15 = sld [smem:[#allocation3 + $0x1]]  ;;  %v18_v0 = vld [vmem:[%s94_s1] sm:$0xff]  ;;  %v19_v1 = vld [vmem:[%s94_s1 + $0x8] sm:$0xff] }
  0x10   :  { %s46_s19 = sld [smem:[#allocation3 + $0x2]]  ;;  %v26_v2 = vadd.f32 3.0, %v18_v0  ;;  %v27_v3 = vadd.f32 3.0, %v19_v1  ;;  %vm20_vm0 = vcmp.ge.f32.partialorder %v18_v0, 0.0  ;;  %vm21_vm1 = vcmp.ge.f32.partialorder %v19_v1, 0.0 }
  0x12   :  { %v28_v4 = vmax.f32 %v26_v2, 0.0  ;;  %v29_v5 = vmax.f32 %v27_v3, 0.0 }
  0x14   :  { %v30_v6 = vmin.f32 %v28_v4, 6.0  ;;  %v31_v7 = vmin.f32 %v29_v5, 6.0 }
  0x15   :  { %v22_v8 = vstv %s15_s14  ;;  %v23_v9 = vstv %s45_s15 }
  0x16   :  { %v24_v10 = vsel %vm20_vm0, %v22_v8, %v23_v9  ;;  %v32_v11 = vstv %s46_s19  ;;  %v25_v12 = vsel %vm21_vm1, %v22_v8, %v23_v9 }
  0x17   :  { %v33_v13 = vmul.f32 %v32_v11, %v30_v6  ;;  %v34_v14 = vmul.f32 %v32_v11, %v31_v7 }
  0x19   :  { %v35_v15 = vadd.f32 %v33_v13, %v24_v10  ;;  %v36_v16 = vadd.f32 %v34_v14, %v25_v12 }
  0x1b   :  { %v37_v17 = vmul.f32 %v35_v15, %v18_v0  ;;  %v38_v18 = vmul.f32 %v36_v16, %v19_v1 }
  0x1d   :  { %39 = vst [vmem:[%s95_s2] sm:$0xff] %v37_v17  ;;  %40 = vst [vmem:[%s95_s2 + $0x8] sm:$0xff] %v38_v18 }

</bundles_post_ra>
